<compile_context>
chip_gen: v6e
topology: v6e:2x2x1
jax: 0.10.0
libtpu: 0.0.40
codegen_flags: <defaults>
</compile_context>

<pallas_src>
import jax
import jax.numpy as jnp
from jax.experimental import pallas as pl
from jax.experimental.pallas import tpu as pltpu

EPS = 1e-12            # torch.nn.functional.normalize default eps
PARAM_ROWS = 144       # packed slab rows (multiple of 8)
PARAM_COLS = 128       # packed slab lanes

# Static row layout inside the packed parameter slab (all f32, zero-padded):
#   rows 0:4   -> W1^T  (4, 25)   in cols 0:25
#   row  4     -> b1    (25,)     in cols 0:25
#   row  5     -> b2    (50,)     in cols 0:50
#   row  6     -> W3[0] (50,)     in cols 0:50
#   row  7     -> W3[1] (50,)     in cols 0:50
#   row  8     -> b3    (2,)      in cols 0:2
#   rows 16:144-> W2^T  (25, 50)  in rows 16:41, cols 0:50 (padded to 128x128)
_B1_ROW = slice(4, 5)
_B2_ROW = slice(5, 6)
_W3_ROW0 = slice(6, 7)
_W3_ROW1 = slice(7, 8)
_B3_ROW = slice(8, 9)
_W2_ROWS = slice(16, 144)


def _qac_actor_kernel(x_ref, p_ref, out_ref):
    x = x_ref[...]                                              # (B, 4) f32

    # --- F.normalize(x, dim=0): per-column L2 norm over the batch axis.
    # x / max(||x||, eps)  ==  x * rsqrt(max(||x||^2, eps^2))   (EUP rsqrt)
    sumsq = jnp.sum(x * x, axis=0, keepdims=True)               # (1, 4)
    xn = x * jax.lax.rsqrt(jnp.maximum(sumsq, EPS * EPS))

    # --- l1: Linear(4, 25) + ReLU  (VPU broadcast-MACs, K=4) --------------
    # Valid outputs live in lanes 0:25; padded lanes stay exactly 0 after ReLU
    # because the packed W1/b1 rows are zero there.
    h1 = (p_ref[_B1_ROW, :]
          + xn[:, 0:1] * p_ref[0:1, :]
          + xn[:, 1:2] * p_ref[1:2, :]
          + xn[:, 2:3] * p_ref[2:3, :]
          + xn[:, 3:4] * p_ref[3:4, :])
    h1 = jnp.maximum(h1, 0.0)                                   # (B, 128)

    # --- l2: Linear(25, 50) + ReLU (single 128x128 MXU pass) --------------
    h2 = jnp.dot(h1, p_ref[_W2_ROWS, :],
                 preferred_element_type=jnp.float32) + p_ref[_B2_ROW, :]
    h2 = jnp.maximum(h2, 0.0)                                   # (B, 128); lanes >= 50 are 0

    # --- actor_l1: Linear(50, 2)  (VPU mul + XLU lane reductions) ---------
    logit0 = (jnp.sum(h2 * p_ref[_W3_ROW0, :], axis=-1, keepdims=True)
              + p_ref[_B3_ROW, 0:1])                            # (B, 1)
    logit1 = (jnp.sum(h2 * p_ref[_W3_ROW1, :], axis=-1, keepdims=True)
              + p_ref[_B3_ROW, 1:2])                            # (B, 1)

    # --- log_softmax over dim 0 (the batch axis); columns are independent --
    def _log_softmax_col(col):                                  # col: (B, 1)
        m = jnp.max(col, axis=0, keepdims=True)
        z = col - m
        return z - jnp.log(jnp.sum(jnp.exp(z), axis=0, keepdims=True))

    out_ref[:, 0:1] = _log_softmax_col(logit0)
    out_ref[:, 1:2] = _log_softmax_col(logit1)


def pack_qac_actor_params(params):
    """Pack PyTorch-layout Linear params into one (144, 128) f32 slab.

    Call ONCE at init / weight-update time, NOT per forward call."""
    slab = jnp.zeros((PARAM_ROWS, PARAM_COLS), jnp.float32)
    slab = slab.at[0:4, 0:25].set(params["w1"].T.astype(jnp.float32))    # (4, 25)
    slab = slab.at[4, 0:25].set(params["b1"].astype(jnp.float32))
    slab = slab.at[5, 0:50].set(params["b2"].astype(jnp.float32))
    slab = slab.at[6, 0:50].set(params["w3"][0].astype(jnp.float32))
    slab = slab.at[7, 0:50].set(params["w3"][1].astype(jnp.float32))
    slab = slab.at[8, 0:2].set(params["b3"].astype(jnp.float32))
    slab = slab.at[16:41, 0:50].set(params["w2"].T.astype(jnp.float32))  # (25, 50)
    return slab


def qac_actor_forward(x, packed_params):
    """x: (B, 4) float32. packed_params: output of pack_qac_actor_params."""
    B = x.shape[0]
    full = lambda shape: pl.BlockSpec(shape, lambda: (0,) * len(shape))
    return pl.pallas_call(
        _qac_actor_kernel,
        out_shape=jax.ShapeDtypeStruct((B, 2), jnp.float32),
        grid_spec=pltpu.PrefetchScalarGridSpec(
            num_scalar_prefetch=0,
            grid=(),
            in_specs=[full(x.shape), full(packed_params.shape)],
            out_specs=full((B, 2)),
        ),
    )(x, packed_params)


def init_params(key):
    """Deterministic synthetic init mimicking torch.nn.Linear shapes/ranges."""
    ks = jax.random.split(key, 6)

    def lin(kw, kb, fan_in, fan_out):
        bound = 1.0 / jnp.sqrt(fan_in)
        w = jax.random.uniform(kw, (fan_out, fan_in), jnp.float32, -bound, bound)
        b = jax.random.uniform(kb, (fan_out,), jnp.float32, -bound, bound)
        return w, b

    w1, b1 = lin(ks[0], ks[1], 4, 25)
    w2, b2 = lin(ks[2], ks[3], 25, 50)
    w3, b3 = lin(ks[4], ks[5], 50, 2)
    return {"w1": w1, "b1": b1, "w2": w2, "b2": b2, "w3": w3, "b3": b3}


def reference_forward(x, p):
    """Pure-JAX reference matching the PyTorch semantics (for sanity check)."""
    hi = jax.lax.Precision.HIGHEST
    xn = x / jnp.maximum(jnp.linalg.norm(x, axis=0, keepdims=True), EPS)
    h1 = jnp.maximum(jnp.dot(xn, p["w1"].T, precision=hi) + p["b1"], 0.0)
    h2 = jnp.maximum(jnp.dot(h1, p["w2"].T, precision=hi) + p["b2"], 0.0)
    logits = jnp.dot(h2, p["w3"].T, precision=hi) + p["b3"]
    return jax.nn.log_softmax(logits, axis=0)


if __name__ == "__main__":
    key = jax.random.PRNGKey(0)
    k_param, k_x = jax.random.split(key)

    params = init_params(k_param)
    packed = pack_qac_actor_params(params)   # one-time packing (hoisted transposes)

    # CartPole state has 4 features; small batch of 8 states.
    x = jax.random.normal(k_x, (8, 4), jnp.float32)

    out = qac_actor_forward(x, packed)
    out = jax.block_until_ready(out)

    ref = reference_forward(x, params)
    assert out.shape == (8, 2)
    assert jnp.allclose(out, ref, atol=1e-4, rtol=1e-4), "mismatch vs reference"

    print("KERNEL_OK")
</pallas_src>

<mosaic_0001>
module attributes {stable_mosaic.version = 11 : i64} {
  func.func @_qac_actor_kernel(%arg0: memref<8x4xf32, #tpu.memory_space<vmem>>, %arg1: memref<144x128xf32, #tpu.memory_space<vmem>>, %arg2: memref<8x2xf32, #tpu.memory_space<vmem>>) attributes {dimension_semantics = [], scalar_prefetch = 0 : i64, scratch_operands = 0 : i64, tpu.core_type = #tpu.core_type<tc>} {
    %c0 = arith.constant 0 : index
    %c0_0 = arith.constant 0 : index
    %0 = vector.load %arg0[%c0, %c0_0] : memref<8x4xf32, #tpu.memory_space<vmem>>, vector<8x4xf32>
    %1 = arith.mulf %0, %0 : vector<8x4xf32>
    %cst = arith.constant dense<0.000000e+00> : vector<4xf32>
    %2 = vector.multi_reduction <add>, %1, %cst [0] : vector<8x4xf32> to vector<4xf32>
    %3 = vector.shape_cast %2 : vector<4xf32> to vector<1x4xf32>
    %cst_1 = arith.constant 1.000000e-24 : f32
    %4 = vector.broadcast %cst_1 : f32 to vector<1x4xf32>
    %5 = arith.maximumf %3, %4 : vector<1x4xf32>
    %6 = math.rsqrt %5 : vector<1x4xf32>
    %7 = vector.broadcast %6 : vector<1x4xf32> to vector<8x4xf32>
    %8 = arith.mulf %0, %7 : vector<8x4xf32>
    %c4 = arith.constant 4 : index
    %c0_2 = arith.constant 0 : index
    %9 = vector.load %arg1[%c4, %c0_2] : memref<144x128xf32, #tpu.memory_space<vmem>>, vector<1x128xf32>
    %10 = vector.extract_strided_slice %8 {offsets = [0, 0], sizes = [8, 1], strides = [1, 1]} : vector<8x4xf32> to vector<8x1xf32>
    %c0_3 = arith.constant 0 : index
    %c0_4 = arith.constant 0 : index
    %11 = vector.load %arg1[%c0_3, %c0_4] : memref<144x128xf32, #tpu.memory_space<vmem>>, vector<1x128xf32>
    %12 = vector.broadcast %10 : vector<8x1xf32> to vector<8x128xf32>
    %13 = vector.broadcast %11 : vector<1x128xf32> to vector<8x128xf32>
    %14 = arith.mulf %12, %13 : vector<8x128xf32>
    %15 = vector.broadcast %9 : vector<1x128xf32> to vector<8x128xf32>
    %16 = arith.addf %15, %14 : vector<8x128xf32>
    %17 = vector.extract_strided_slice %8 {offsets = [0, 1], sizes = [8, 1], strides = [1, 1]} : vector<8x4xf32> to vector<8x1xf32>
    %c1 = arith.constant 1 : index
    %c0_5 = arith.constant 0 : index
    %18 = vector.load %arg1[%c1, %c0_5] : memref<144x128xf32, #tpu.memory_space<vmem>>, vector<1x128xf32>
    %19 = vector.broadcast %17 : vector<8x1xf32> to vector<8x128xf32>
    %20 = vector.broadcast %18 : vector<1x128xf32> to vector<8x128xf32>
    %21 = arith.mulf %19, %20 : vector<8x128xf32>
    %22 = arith.addf %16, %21 : vector<8x128xf32>
    %23 = vector.extract_strided_slice %8 {offsets = [0, 2], sizes = [8, 1], strides = [1, 1]} : vector<8x4xf32> to vector<8x1xf32>
    %c2 = arith.constant 2 : index
    %c0_6 = arith.constant 0 : index
    %24 = vector.load %arg1[%c2, %c0_6] : memref<144x128xf32, #tpu.memory_space<vmem>>, vector<1x128xf32>
    %25 = vector.broadcast %23 : vector<8x1xf32> to vector<8x128xf32>
    %26 = vector.broadcast %24 : vector<1x128xf32> to vector<8x128xf32>
    %27 = arith.mulf %25, %26 : vector<8x128xf32>
    %28 = arith.addf %22, %27 : vector<8x128xf32>
    %29 = vector.extract_strided_slice %8 {offsets = [0, 3], sizes = [8, 1], strides = [1, 1]} : vector<8x4xf32> to vector<8x1xf32>
    %c3 = arith.constant 3 : index
    %c0_7 = arith.constant 0 : index
    %30 = vector.load %arg1[%c3, %c0_7] : memref<144x128xf32, #tpu.memory_space<vmem>>, vector<1x128xf32>
    %31 = vector.broadcast %29 : vector<8x1xf32> to vector<8x128xf32>
    %32 = vector.broadcast %30 : vector<1x128xf32> to vector<8x128xf32>
    %33 = arith.mulf %31, %32 : vector<8x128xf32>
    %34 = arith.addf %28, %33 : vector<8x128xf32>
    %cst_8 = arith.constant 0.000000e+00 : f32
    %35 = vector.broadcast %cst_8 : f32 to vector<8x128xf32>
    %36 = arith.maximumf %34, %35 : vector<8x128xf32>
    %c16 = arith.constant 16 : index
    %c0_9 = arith.constant 0 : index
    %37 = vector.load %arg1[%c16, %c0_9] : memref<144x128xf32, #tpu.memory_space<vmem>>, vector<128x128xf32>
    %cst_10 = arith.constant dense<0.000000e+00> : vector<8x128xf32>
    %38 = tpu.matmul %36, %37, %cst_10 {dimension_numbers = #tpu.dot_dimension_numbers<[1], [0], [0], [1], [0, 0, 1, 1], [], []>} : vector<8x128xf32>, vector<128x128xf32>, vector<8x128xf32> -> vector<8x128xf32>
    %c5 = arith.constant 5 : index
    %c0_11 = arith.constant 0 : index
    %39 = vector.load %arg1[%c5, %c0_11] : memref<144x128xf32, #tpu.memory_space<vmem>>, vector<1x128xf32>
    %40 = vector.broadcast %39 : vector<1x128xf32> to vector<8x128xf32>
    %41 = arith.addf %38, %40 : vector<8x128xf32>
    %cst_12 = arith.constant 0.000000e+00 : f32
    %42 = vector.broadcast %cst_12 : f32 to vector<8x128xf32>
    %43 = arith.maximumf %41, %42 : vector<8x128xf32>
    %c6 = arith.constant 6 : index
    %c0_13 = arith.constant 0 : index
    %44 = vector.load %arg1[%c6, %c0_13] : memref<144x128xf32, #tpu.memory_space<vmem>>, vector<1x128xf32>
    %45 = vector.broadcast %44 : vector<1x128xf32> to vector<8x128xf32>
    %46 = arith.mulf %43, %45 : vector<8x128xf32>
    %cst_14 = arith.constant dense<0.000000e+00> : vector<8xf32>
    %47 = vector.multi_reduction <add>, %46, %cst_14 [1] : vector<8x128xf32> to vector<8xf32>
    %48 = vector.shape_cast %47 : vector<8xf32> to vector<8x1xf32>
    %c8 = arith.constant 8 : index
    %c0_15 = arith.constant 0 : index
    %49 = vector.load %arg1[%c8, %c0_15] : memref<144x128xf32, #tpu.memory_space<vmem>>, vector<1x1xf32>
    %50 = vector.broadcast %49 : vector<1x1xf32> to vector<8x1xf32>
    %51 = arith.addf %48, %50 : vector<8x1xf32>
    %c7 = arith.constant 7 : index
    %c0_16 = arith.constant 0 : index
    %52 = vector.load %arg1[%c7, %c0_16] : memref<144x128xf32, #tpu.memory_space<vmem>>, vector<1x128xf32>
    %53 = vector.broadcast %52 : vector<1x128xf32> to vector<8x128xf32>
    %54 = arith.mulf %43, %53 : vector<8x128xf32>
    %cst_17 = arith.constant dense<0.000000e+00> : vector<8xf32>
    %55 = vector.multi_reduction <add>, %54, %cst_17 [1] : vector<8x128xf32> to vector<8xf32>
    %56 = vector.shape_cast %55 : vector<8xf32> to vector<8x1xf32>
    %c8_18 = arith.constant 8 : index
    %c1_19 = arith.constant 1 : index
    %57 = vector.load %arg1[%c8_18, %c1_19] : memref<144x128xf32, #tpu.memory_space<vmem>>, vector<1x1xf32>
    %58 = vector.broadcast %57 : vector<1x1xf32> to vector<8x1xf32>
    %59 = arith.addf %56, %58 : vector<8x1xf32>
    %cst_20 = arith.constant dense<0xFF800000> : vector<1xf32>
    %60 = vector.multi_reduction <maximumf>, %51, %cst_20 [0] : vector<8x1xf32> to vector<1xf32>
    %61 = vector.shape_cast %60 : vector<1xf32> to vector<1x1xf32>
    %62 = vector.broadcast %61 : vector<1x1xf32> to vector<8x1xf32>
    %63 = arith.subf %51, %62 : vector<8x1xf32>
    %64 = math.exp %63 : vector<8x1xf32>
    %cst_21 = arith.constant dense<0.000000e+00> : vector<1xf32>
    %65 = vector.multi_reduction <add>, %64, %cst_21 [0] : vector<8x1xf32> to vector<1xf32>
    %66 = vector.shape_cast %65 : vector<1xf32> to vector<1x1xf32>
    %67 = math.log %66 : vector<1x1xf32>
    %68 = vector.broadcast %67 : vector<1x1xf32> to vector<8x1xf32>
    %69 = arith.subf %63, %68 : vector<8x1xf32>
    %c0_22 = arith.constant 0 : index
    %c0_23 = arith.constant 0 : index
    %70 = vector.load %arg2[%c0_22, %c0_23] : memref<8x2xf32, #tpu.memory_space<vmem>>, vector<8x1xf32>
    tpu.vector_store %arg2[%c0_22, %c0_23], %69 {strides = array<i32>} : memref<8x2xf32, #tpu.memory_space<vmem>>, vector<8x1xf32>,
    %cst_24 = arith.constant dense<0xFF800000> : vector<1xf32>
    %71 = vector.multi_reduction <maximumf>, %59, %cst_24 [0] : vector<8x1xf32> to vector<1xf32>
    %72 = vector.shape_cast %71 : vector<1xf32> to vector<1x1xf32>
    %73 = vector.broadcast %72 : vector<1x1xf32> to vector<8x1xf32>
    %74 = arith.subf %59, %73 : vector<8x1xf32>
    %75 = math.exp %74 : vector<8x1xf32>
    %cst_25 = arith.constant dense<0.000000e+00> : vector<1xf32>
    %76 = vector.multi_reduction <add>, %75, %cst_25 [0] : vector<8x1xf32> to vector<1xf32>
    %77 = vector.shape_cast %76 : vector<1xf32> to vector<1x1xf32>
    %78 = math.log %77 : vector<1x1xf32>
    %79 = vector.broadcast %78 : vector<1x1xf32> to vector<8x1xf32>
    %80 = arith.subf %74, %79 : vector<8x1xf32>
    %c0_26 = arith.constant 0 : index
    %c1_27 = arith.constant 1 : index
    %81 = vector.load %arg2[%c0_26, %c1_27] : memref<8x2xf32, #tpu.memory_space<vmem>>, vector<8x1xf32>
    tpu.vector_store %arg2[%c0_26, %c1_27], %80 {strides = array<i32>} : memref<8x2xf32, #tpu.memory_space<vmem>>, vector<8x1xf32>,
    return
  }
}

</mosaic_0001>

<bundles_post_ra>
// kernel: tpu_custom_call.1
= control target key start
LH: loop header
LB: loop body
LE: loop exit
PB: predicated region body
PF: predicated region fallthrough
CT: control target
= control target key end

     0   :  { %7 = vsyncpa [#allocation3], 0  ;;  %s360_s9 = smov [#allocation2]   ;;  %s419_s0 = inlined_call_operand.vmem [shape: f32[8,4], index: 0, kind: input, shape index: {}]   ;;  %s420_s1 = inlined_call_operand.hbm [shape: f32[144,128], index: 1, kind: input, shape index: {}]   ;;  %s421_s2 = inlined_call_operand.vmem [shape: f32[8,2], index: 2, kind: output, shape index: {}]  }
   0x1   :  { %s15_s10 = sshll.u32 %s360_s9, 4  ;;  %s16_s10 = int_to_ptr.vmem [resolvable:$true] %s15_s10 }
   0x2   :  { %s346_s11 = scalar_lea.vmem %s16_s10, 2304  ;;  %p351_p1 = scmp.lt.s32.totalorder %s16_s10, %s16_s10 }
   0x3   :  { %p347_p0 = scmp.ne.s32.totalorder %s16_s10, %s346_s11  ;;  %p352_p2 = scmp.lt.s32.totalorder %s346_s11, %s346_s11 }
   0x5   :  { %p353_p3 = por %p352_p2, %p351_p1 }
   0x7   :  { %p354_p4 = pnand %p353_p3, %p347_p0 }
   0x9   :  { %357 = shalt.err (!%p354_p4)
}
   0xa   :  { %s361_s12 = smov 128   ;;  %s362_s13 = smov 8  }
   0xb   :  { %21 = dma.hbm_to_vmem [thread:$0]  %s420_s1, 2304, %s16_s10, [#allocation3], %s361_s12, %s361_s12, %s362_s13  }
   0xc   :  { %358 = dma.done.wait [#allocation3], 2304  }
   0xd   :  { %359 = vsyncadd [#allocation3], 4294964992  ;;  %v363_v0 = vmov 0   ;;  %v364_v1 = vmov 2   ;;  %v365_v2 = vmov 0.0   ;;  %v25_v3 = vld [vmem:[%s419_s0] sm:$0xff] }
   0xe   :  { %323 = vset.pattern.permute.xlu0 %v363_v0  ;;  %325 = vset.pattern.permute.xlu1 %v364_v1  ;;  %vm27_vm0 = vcmask 31744   ;;  %v104_v4 = vld [vmem:[#allocation2 + $0x88] sm:$0xff]  ;;  %v103_v5 = vld [vmem:[#allocation2 + $0x80] sm:$0xff]  ;;  %v26_v6 = vmul.f32 %v25_v3, %v25_v3  ;;  %v102_v7 = vld [vmem:[#allocation2 + $0x78] sm:$0xff]  ;;  %v366_v27 = vmov 1   ;;  %v367_v28 = vmov 3  }
   0xf   :  { %279 = vmatprep.subr.mxu0 %v365_v2  ;;  %v101_v10 = vld [vmem:[#allocation2 + $0x70] sm:$0xff]  ;;  %v100_v12 = vld [vmem:[#allocation2 + $0x68] sm:$0xff]  ;;  %v99_v14 = vld [vmem:[#allocation2 + $0x60] sm:$0xff]  ;;  %vm368_vm1 = vmmov 0   ;;  %vm226_vm2 = vcmask 15368   ;;  %vm204_vm3 = vcmask 7168  }
  0x10   :  { %280 = vmatpush3.msra.mxu0 %v104_v4  ;;  %v28_v8 = vsel %vm27_vm0, %v26_v6, 0.0  ;;  %v98_v16 = vld [vmem:[#allocation2 + $0x58] sm:$0xff]  ;;  %v97_v18 = vld [vmem:[#allocation2 + $0x50] sm:$0xff]  ;;  %v96_v21 = vld [vmem:[#allocation2 + $0x48] sm:$0xff]  ;;  %311 = vmatprep.mubr.msk.f32.mxu0 %vm368_vm1, %v365_v2 }
  0x11   :  { %281 = vmatprep.subr.mxu0 %v365_v2  ;;  %v29_v9 = vrot.slane %v28_v8, 4  ;;  %v95_v23 = vld [vmem:[#allocation2 + $0x40] sm:$0xff]  ;;  %v94_v25 = vld [vmem:[#allocation2 + $0x38] sm:$0xff]  ;;  %v93_v26 = vld [vmem:[#allocation2 + $0x30] sm:$0xff] }
  0x12   :  { %282 = vmatpush3.msra.mxu0 %v103_v5  ;;  %v92_v29 = vld [vmem:[#allocation2 + $0x28] sm:$0xff]  ;;  %v91_v30 = vld [vmem:[#allocation2 + $0x20] sm:$0xff]  ;;  %v90_v31 = vld [vmem:[#allocation2 + $0x18] sm:$0xff] }
  0x13   :  { %283 = vmatprep.subr.mxu0 %v365_v2  ;;  %v30_v11 = vadd.f32 %v29_v9, %v28_v8  ;;  %v89_v32 = vld [vmem:[#allocation2 + $0x10] sm:$0xff]  ;;  %v253_v33 = vld [vmem:[#allocation2] ss:$0 sm:$0xff]  ;;  %v254_v37 = vld [vmem:[#allocation2 + $0x4] ss:$0 sm:$0xff] }
  0x14   :  { %284 = vmatpush3.msra.mxu0 %v102_v7  ;;  %v255_v38 = vld [vmem:[#allocation2 + $0x1] ss:$0 sm:$0xff]  ;;  %v256_v39 = vld [vmem:[#allocation2 + $0x2] ss:$0 sm:$0xff]  ;;  %v257_v41 = vld [vmem:[#allocation2 + $0x3] ss:$0 sm:$0xff] }
  0x15   :  { %285 = vmatprep.subr.mxu0 %v365_v2  ;;  %v31_v13 = vrot.slane %v30_v11, 2  ;;  %v258_v51 = vld [vmem:[#allocation2 + $0x5] ss:$0 sm:$0xff]  ;;  %v261_v55 = vld [vmem:[#allocation2 + $0x7] ss:$0 sm:$0xff] }
  0x16   :  { %286 = vmatpush3.msra.mxu0 %v101_v10  ;;  %v259_v56 = vld [vmem:[#allocation2 + $0x6] ss:$0 sm:$0xff]  ;;  %v260_v60 = vld [vmem:[#allocation2 + $0x8] ss:$0 sm:$0xff] }
  0x17   :  { %287 = vmatprep.subr.mxu0 %v365_v2  ;;  %v32_v15 = vadd.f32 %v31_v13, %v30_v11 }
  0x18   :  { %288 = vmatpush3.msra.mxu0 %v100_v12 }
  0x19   :  { %289 = vmatprep.subr.mxu0 %v365_v2  ;;  %v33_v17 = vrot.slane %v32_v15, 1 }
  0x1a   :  { %290 = vmatpush3.msra.mxu0 %v99_v14 }
  0x1b   :  { %291 = vmatprep.subr.mxu0 %v365_v2  ;;  %v34_v19 = vadd.f32 %v33_v17, %v32_v15 }
  0x1c   :  { %292 = vmatpush3.msra.mxu0 %v98_v16 }
  0x1d   :  { %293 = vmatprep.subr.mxu0 %v365_v2  ;;  %v35_v20 = vmax.f32 %v34_v19, 1e-24 }
  0x1e   :  { %294 = vmatpush3.msra.mxu0 %v97_v18 }
  0x1f   :  { %295 = vmatprep.subr.mxu0 %v365_v2  ;;  %328 = vrsqrt.f32 %v35_v20 }
  0x20   :  { %296 = vmatpush3.msra.mxu0 %v96_v21 }
  0x21   :  { %297 = vmatprep.subr.mxu0 %v365_v2 }
  0x22   :  { %298 = vmatpush3.msra.mxu0 %v95_v23 }
  0x23   :  { %299 = vmatprep.subr.mxu0 %v365_v2 }
  0x24   :  { %300 = vmatpush3.msra.mxu0 %v94_v25 }
  0x25   :  { %301 = vmatprep.subr.mxu0 %v365_v2 }
  0x26   :  { %302 = vmatpush3.msra.mxu0 %v93_v26 }
  0x27   :  { %303 = vmatprep.subr.mxu0 %v365_v2 }
  0x28   :  { %304 = vmatpush3.msra.mxu0 %v92_v29 }
  0x29   :  { %305 = vmatprep.subr.mxu0 %v365_v2 }
  0x2a   :  { %306 = vmatpush3.msra.mxu0 %v91_v30 }
  0x2b   :  { %307 = vmatprep.subr.mxu0 %v365_v2 }
  0x2c   :  { %v329_v22 = vpop.eup %328  ;;  %308 = vmatpush3.msra.mxu0 %v90_v31 }
  0x2d   :  { %v37_v24 = vmul.f32 %v329_v22, %v25_v3  ;;  %309 = vmatprep.subr.mxu0 %v365_v2 }
  0x2e   :  { %310 = vmatpush3.msra.mxu0 %v89_v32 }
  0x2f   :  { %42 = vperm.xlu0 %323, %v37_v24   ;;  %68 = vperm.xlu1 %325, %v37_v24  }
  0x33   :  { %324 = vset.pattern.permute.xlu0 %v366_v27  ;;  %326 = vset.pattern.permute.xlu1 %v367_v28 }
  0x34   :  { %57 = vperm.xlu0 %324, %v37_v24   ;;  %79 = vperm.xlu1 %326, %v37_v24  }
  0x38   :  { %327 = vset.pattern.permute.xlu0 %v367_v28 }
  0xaa   :  { %v43_v34 = vpop.permute.xlu0 %42  ;;  %v69_v35 = vpop.permute.xlu1 %68 }
  0xab   :  { %v49_v36 = vmul.f32 %v253_v33, %v43_v34  ;;  %v75_v45 = vmul.f32 %v256_v39, %v69_v35 }
  0xad   :  { %v54_v43 = vadd.f32 %v254_v37, %v49_v36 }
  0xaf   :  { %v58_v40 = vpop.permute.xlu0 %57  ;;  %v80_v42 = vpop.permute.xlu1 %79 }
  0xb0   :  { %v64_v44 = vmul.f32 %v255_v38, %v58_v40  ;;  %v86_v47 = vmul.f32 %v257_v41, %v80_v42 }
  0xb2   :  { %v65_v46 = vadd.f32 %v64_v44, %v54_v43 }
  0xb4   :  { %v76_v48 = vadd.f32 %v75_v45, %v65_v46 }
  0xb6   :  { %v87_v49 = vadd.f32 %v86_v47, %v76_v48 }
  0xb8   :  { %v88_v50 = vmax.f32 %v87_v49, 0.0 }
  0xba   :  { %312 = vmatmul.mubr.f32.vlgmr.msra.gmra.mxu0 %v88_v50 }
 0x17a   :  { %v176_v52 = vpop.f32.mrf.mxu0 }
 0x17b   :  { %v177_v53 = vadd.f32 %v258_v51, %v176_v52 }
 0x17c   :  { %v313_v54 = vpop.f32.mrf.mxu0 }
 0x17d   :  { %v180_v57 = vmax.f32 %v177_v53, 0.0 }
 0x17f   :  { %v200_v58 = vmul.f32 %v261_v55, %v180_v57  ;;  %v186_v59 = vmul.f32 %v259_v56, %v180_v57 }
 0x181   :  { %201 = vadd.xlane.f32.xlu0 %v200_v58  ;;  %187 = vadd.xlane.f32.xlu1 %v186_v59 }
 0x20a   :  { %v202_v61 = vpop.xlane.xlu0 %201  ;;  %v188_v62 = vpop.xlane.xlu1 %187 }
 0x20b   :  { %v203_v63 = vadd.f32 %v260_v60, %v202_v61  ;;  %v194_v0 = vadd.f32 %v260_v60, %v188_v62 }
 0x20d   :  { %v227_v1 = vsel %vm226_vm2, %v203_v63, -inf  ;;  %v205_v2 = vsel %vm204_vm3, %v194_v0, -inf }
 0x20e   :  { %v228_v3 = vrot.slane %v227_v1, 4  ;;  %v206_v4 = vrot.slane %v205_v2, 4 }
 0x210   :  { %v229_v5 = vmax.f32 %v227_v1, %v228_v3  ;;  %v207_v6 = vmax.f32 %v205_v2, %v206_v4 }
 0x212   :  { %v230_v7 = vrot.slane %v229_v5, 2  ;;  %v208_v8 = vrot.slane %v207_v6, 2 }
 0x214   :  { %v231_v9 = vmax.f32 %v229_v5, %v230_v7  ;;  %v209_v10 = vmax.f32 %v207_v6, %v208_v8 }
 0x216   :  { %v232_v11 = vrot.slane %v231_v9, 1  ;;  %v210_v12 = vrot.slane %v209_v10, 1 }
 0x218   :  { %v233_v13 = vmax.f32 %v231_v9, %v232_v11  ;;  %v211_v14 = vmax.f32 %v209_v10, %v210_v12 }
 0x21a   :  { %v234_v15 = vsub.f32 %v203_v63, %v233_v13  ;;  %v212_v16 = vsub.f32 %v194_v0, %v211_v14 }
 0x21c   :  { %v235_v17 = vmul.f32 1.442695, %v234_v15  ;;  %v213_v18 = vmul.f32 1.442695, %v212_v16 }
 0x21e   :  { %330 = vpow2.f32 %v235_v17 }
 0x21f   :  { %332 = vpow2.f32 %v213_v18 }
 0x22b   :  { %v331_v19 = vpop.eup %330 }
 0x22c   :  { %v333_v20 = vpop.eup %332  ;;  %v237_v21 = vsel %vm226_vm2, %v331_v19, 0.0 }
 0x22d   :  { %v238_v22 = vrot.slane %v237_v21, 4  ;;  %v215_v23 = vsel %vm204_vm3, %v333_v20, 0.0 }
 0x22e   :  { %v216_v24 = vrot.slane %v215_v23, 4 }
 0x22f   :  { %v239_v25 = vadd.f32 %v238_v22, %v237_v21 }
 0x230   :  { %v217_v26 = vadd.f32 %v216_v24, %v215_v23 }
 0x231   :  { %v240_v27 = vrot.slane %v239_v25, 2 }
 0x232   :  { %v218_v28 = vrot.slane %v217_v26, 2 }
 0x233   :  { %v241_v29 = vadd.f32 %v240_v27, %v239_v25 }
 0x234   :  { %v219_v30 = vadd.f32 %v218_v28, %v217_v26 }
 0x235   :  { %v242_v31 = vrot.slane %v241_v29, 1 }
 0x236   :  { %v220_v32 = vrot.slane %v219_v30, 1 }
 0x237   :  { %v243_v33 = vadd.f32 %v242_v31, %v241_v29 }
 0x238   :  { %v221_v34 = vadd.f32 %v220_v32, %v219_v30 }
 0x239   :  { %334 = vlog2.f32 %v243_v33 }
 0x23a   :  { %336 = vlog2.f32 %v221_v34 }
 0x246   :  { %v335_v35 = vpop.eup %334 }
 0x247   :  { %v337_v36 = vpop.eup %336  ;;  %v245_v37 = vmul.f32 0.6931472, %v335_v35 }
 0x248   :  { %v223_v38 = vmul.f32 0.6931472, %v337_v36 }
 0x249   :  { %v246_v39 = vsub.f32 %v234_v15, %v245_v37 }
 0x24a   :  { %v224_v40 = vsub.f32 %v212_v16, %v223_v38 }
 0x24c   :  { %225 = vst.msk [vmem:[%s421_s2] sm:$0xff] %vm204_vm3, %v224_v40 }
 0x24d   :  { %247 = vst.msk [vmem:[%s421_s2] sm:$0xff] %vm226_vm2, %v246_v39 }
 0x24e   :  { %252 = vsyncpa [#allocation3], 1 }

</bundles_post_ra>
